<compile_context>
chip_gen: v6e
topology: v6e:2x2x1
jax: 0.10.0
libtpu: 0.0.40
codegen_flags: <defaults>
</compile_context>

<pallas_src>
import jax
import jax.numpy as jnp
from jax.experimental import pallas as pl
from jax.experimental.pallas import tpu as pltpu

LANE = 128
_MAX_LANE_TILE = 1024          # streaming kernels saturate HBM by ~512-1024 lanes
_IMG_VMEM_BUDGET = 6 << 20     # budget for the 4 double-buffered img blocks (in+out)


def _color_jitter_kernel(x_ref, scale_ref, bias_ref, o_ref):
    # x_ref / o_ref: (B*C, lane_tile) in the image's native dtype.
    # scale_ref / bias_ref: (B*C, 1) f32, broadcast along lanes.
    x = x_ref[...].astype(jnp.float32)
    y = x * scale_ref[...] + bias_ref[...]
    if jnp.issubdtype(o_ref.dtype, jnp.integer):
        y = jnp.round(y)
    o_ref[...] = y.astype(o_ref.dtype)


def _round_up(x: int, m: int) -> int:
    return -(-x // m) * m


def _pick_lane_tile(hw: int, n_rows: int, itemsize: int) -> int:
    """Fixed multiple-of-128 lane tile. Accounts for sublane padding of the
    row dim and for in+out double buffering (4 block-sized VMEM buffers)."""
    if hw < LANE:
        return hw                                     # full dim: always a legal block
    sublane_pack = max(8, 32 // max(1, itemsize))     # f32: 8, bf16: 16, int8: 32
    rows_padded = _round_up(n_rows, sublane_pack)
    bytes_per_lane = rows_padded * itemsize * 4       # in + out, double-buffered
    cap = max(LANE, (_IMG_VMEM_BUDGET // bytes_per_lane) // LANE * LANE)
    return min(_MAX_LANE_TILE, cap, _round_up(hw, LANE))


def color_jitter(img, mean, std):
    """JAX/Pallas equivalent of ColorJitter.forward: (img - mean) / std with
    mean/std of shape (B, C, 1, 1), computed as img * (1/std) + (-mean/std)."""
    B, C, H, W = img.shape
    HW = H * W
    BC = B * C

    # Contiguous trailing-dim merges: no HBM copy of img.
    x = img.reshape(BC, HW)
    scale = (1.0 / std.astype(jnp.float32)).reshape(BC, 1)           # B*C floats
    bias = -mean.astype(jnp.float32).reshape(BC, 1) * scale

    tile = _pick_lane_tile(HW, BC, jnp.dtype(img.dtype).itemsize)
    grid = (pl.cdiv(HW, tile),)

    img_spec = pl.BlockSpec((BC, tile), lambda j: (0, j))
    par_spec = pl.BlockSpec((BC, 1), lambda j: (0, 0))

    out = pl.pallas_call(
        _color_jitter_kernel,
        out_shape=jax.ShapeDtypeStruct((BC, HW), img.dtype),
        grid=grid,
        in_specs=[img_spec, par_spec, par_spec],
        out_specs=img_spec,
        compiler_params=pltpu.CompilerParams(
            dimension_semantics=("parallel",)),
    )(x, scale, bias)
    return out.reshape(B, C, H, W)


def make_colorjitter_params(key, batch_size, mean_p=1.0, std_p=1.0):
    """Equivalent of ColorJitter.shuffle(): random per-(batch, channel) mean/std."""
    k_m, k_s = jax.random.split(key)
    mean = (jax.random.uniform(k_m, (batch_size, 3, 1, 1), jnp.float32) - 0.5) * 2.0 * mean_p
    std = jnp.exp((jax.random.uniform(k_s, (batch_size, 3, 1, 1), jnp.float32) - 0.5) * 2.0 * std_p)
    return mean, std


class ColorJitter:
    """Mirror of the PyTorch module: stateful mean/std, pure-Pallas forward.
    shuffle_every regenerates params wrapper-side before each call."""

    def __init__(self, batch_size, shuffle_every=False, mean=1.0, std=1.0,
                 key=jax.random.PRNGKey(0)):
        self.batch_size, self.mean_p, self.std_p = batch_size, mean, std
        self.shuffle_every = shuffle_every
        self._key = key
        self.shuffle()

    def shuffle(self):
        self._key, sub = jax.random.split(self._key)
        self.mean, self.std = make_colorjitter_params(
            sub, self.batch_size, self.mean_p, self.std_p)

    def __call__(self, img):
        if self.shuffle_every:
            self.shuffle()
        return color_jitter(img, self.mean, self.std)


if __name__ == "__main__":
    key = jax.random.PRNGKey(0)
    k_img, k_params = jax.random.split(key)

    B, C, H, W = 2, 3, 16, 16          # ColorJitter operates on 3-channel images
    img = jax.random.uniform(k_img, (B, C, H, W), dtype=jnp.float32)
    mean, std = make_colorjitter_params(k_params, B, mean_p=1.0, std_p=1.0)

    out = color_jitter(img, mean, std)
    out = jax.block_until_ready(out)

    ref = (img - mean) / std
    assert out.shape == img.shape and out.dtype == img.dtype
    assert jnp.allclose(out, ref, atol=1e-5, rtol=1e-5), "mismatch vs reference"

    print("KERNEL_OK")
</pallas_src>

<mosaic_0001>
module attributes {stable_mosaic.version = 11 : i64} {
  func.func @_color_jitter_kernel(%arg0: i32, %arg1: memref<6x256xf32, #tpu.memory_space<vmem>>, %arg2: memref<6x1xf32, #tpu.memory_space<vmem>>, %arg3: memref<6x1xf32, #tpu.memory_space<vmem>>, %arg4: memref<6x256xf32, #tpu.memory_space<vmem>>) attributes {dimension_semantics = [#tpu.dimension_semantics<parallel>], iteration_bounds = array<i64: 1>, scalar_prefetch = 0 : i64, scratch_operands = 0 : i64, tpu.core_type = #tpu.core_type<tc>, window_params = [{transform_indices = @transform_0, window_bounds = array<i64: 6, 256>}, {pipeline_mode = #tpu.pipeline_mode<synchronous>, transform_indices = @transform_1, window_bounds = array<i64: 6, 1>}, {pipeline_mode = #tpu.pipeline_mode<synchronous>, transform_indices = @transform_2, window_bounds = array<i64: 6, 1>}, {transform_indices = @transform_3, window_bounds = array<i64: 6, 256>}]} {
    %c0 = arith.constant 0 : index
    %c0_0 = arith.constant 0 : index
    %0 = vector.load %arg1[%c0, %c0_0] : memref<6x256xf32, #tpu.memory_space<vmem>>, vector<6x256xf32>
    %c0_1 = arith.constant 0 : index
    %c0_2 = arith.constant 0 : index
    %1 = vector.load %arg2[%c0_1, %c0_2] : memref<6x1xf32, #tpu.memory_space<vmem>>, vector<6x1xf32>
    %2 = vector.broadcast %1 : vector<6x1xf32> to vector<6x256xf32>
    %3 = arith.mulf %0, %2 : vector<6x256xf32>
    %c0_3 = arith.constant 0 : index
    %c0_4 = arith.constant 0 : index
    %4 = vector.load %arg3[%c0_3, %c0_4] : memref<6x1xf32, #tpu.memory_space<vmem>>, vector<6x1xf32>
    %5 = vector.broadcast %4 : vector<6x1xf32> to vector<6x256xf32>
    %6 = arith.addf %3, %5 : vector<6x256xf32>
    %c0_5 = arith.constant 0 : index
    %c0_6 = arith.constant 0 : index
    %7 = vector.load %arg4[%c0_5, %c0_6] : memref<6x256xf32, #tpu.memory_space<vmem>>, vector<6x256xf32>
    tpu.vector_store %arg4[%c0_5, %c0_6], %6 {strides = array<i32>} : memref<6x256xf32, #tpu.memory_space<vmem>>, vector<6x256xf32>,
    return
  }
  func.func @transform_0(%arg0: i32) -> (i32, i32) {
    %c0_i32 = arith.constant 0 : i32
    %c0_i32_0 = arith.constant 0 : i32
    return %c0_i32, %arg0 : i32, i32
  }
  func.func @transform_1(%arg0: i32) -> (i32, i32) {
    %c0_i32 = arith.constant 0 : i32
    %c0_i32_0 = arith.constant 0 : i32
    %c0_i32_1 = arith.constant 0 : i32
    return %c0_i32, %c0_i32_0 : i32, i32
  }
  func.func @transform_2(%arg0: i32) -> (i32, i32) {
    %c0_i32 = arith.constant 0 : i32
    %c0_i32_0 = arith.constant 0 : i32
    %c0_i32_1 = arith.constant 0 : i32
    return %c0_i32, %c0_i32_0 : i32, i32
  }
  func.func @transform_3(%arg0: i32) -> (i32, i32) {
    %c0_i32 = arith.constant 0 : i32
    %c0_i32_0 = arith.constant 0 : i32
    return %c0_i32, %arg0 : i32, i32
  }
}

</mosaic_0001>

<bundles_post_ra>
// kernel: tpu_custom_call.1
= control target key start
LH: loop header
LB: loop body
LE: loop exit
PB: predicated region body
PF: predicated region fallthrough
CT: control target
= control target key end

     0   :  { %v74_v1 = vmov 0   ;;  %s111_s0 = inlined_call_operand.vmem [shape: f32[6,256], index: 0, kind: input, shape index: {}]   ;;  %s112_s1 = inlined_call_operand.vmem [shape: f32[6,1], index: 1, kind: input, shape index: {}]   ;;  %s113_s2 = inlined_call_operand.vmem [shape: f32[6,1], index: 2, kind: input, shape index: {}]   ;;  %s114_s3 = inlined_call_operand.hbm [shape: f32[6,256], index: 3, kind: output, shape index: {}]  }
   0x1   :  { %v17_v0 = vld [vmem:[%s112_s1] sm:$0x3f]  ;;  %51 = vset.pattern.permute.xlu0 %v74_v1 }
   0x2   :  { %8 = vsyncpa [#allocation3], 0  ;;  %20 = vperm.xlu0 %51, %v17_v0   ;;  %v25_v2 = vld [vmem:[%s113_s2] sm:$0x3f]  ;;  %v16_v5 = vld [vmem:[%s111_s0 + $0x8] sm:$0x3f] }
   0x3   :  { %v15_v4 = vld [vmem:[%s111_s0] sm:$0x3f]  ;;  %s75_s20 = smov [#allocation2]  }
   0x4   :  { %s41_s1 = sshll.u32 %s75_s20, 4  ;;  %s42_s1 = int_to_ptr.vmem [resolvable:$true] %s41_s1 }
   0x5   :  { %s52_s2 = scalar_lea.vmem %s42_s1, 256  ;;  %p57_p1 = scmp.lt.s32.totalorder %s42_s1, %s42_s1 }
   0x6   :  { %28 = vperm.xlu0 %51, %v25_v2   ;;  %p53_p0 = scmp.ne.s32.totalorder %s42_s1, %s52_s2  ;;  %p58_p2 = scmp.lt.s32.totalorder %s52_s2, %s52_s2 }
   0x8   :  { %p59_p3 = por %p58_p2, %p57_p1 }
   0xa   :  { %p60_p4 = pnand %p59_p3, %p53_p0 }
  0x7d   :  { %v21_v3 = vpop.permute.xlu0 %20 }
  0x7e   :  { %v23_v6 = vmul.f32 %v21_v3, %v15_v4  ;;  %v24_v7 = vmul.f32 %v21_v3, %v16_v5 }
  0x81   :  { %v29_v8 = vpop.permute.xlu0 %28 }
  0x82   :  { %v31_v9 = vadd.f32 %v29_v8, %v23_v6  ;;  %v32_v10 = vadd.f32 %v29_v8, %v24_v7 }
  0x84   :  { %33 = vst [vmem:[#allocation2] sm:$0x3f] %v31_v9  ;;  %34 = vst [vmem:[#allocation2 + $0x8] sm:$0x3f] %v32_v10 }
  0x85   :  { %63 = shalt.err (!%p60_p4)
}
  0x86   :  { %44 = dma.vmem_to_hbm [thread:$0]  %s42_s1, 256, %s114_s3, [#allocation3]  }
  0x87   :  { %72 = dma.done.wait [#allocation3], 256  }
  0x88   :  { %73 = vsyncadd [#allocation3], 4294967040 }
  0x89   :  { %48 = vsyncpa [#allocation3], 1 }

</bundles_post_ra>
